<compile_context>
chip_gen: v7x
topology: tpu7x:2x2x1
jax: 0.10.0
libtpu: 0.0.40
codegen_flags: <defaults>
</compile_context>

<pallas_src>
import functools

import jax
import jax.numpy as jnp
from jax.experimental import pallas as pl
from jax.experimental.pallas import tpu as pltpu


def _round_up(n: int, m: int) -> int:
    return (n + m - 1) // m * m


def _vmem_ceiling_bytes() -> int:
    """Per-generation scoped-VMEM ceiling with ~20% headroom."""
    try:
        cap = int(pltpu.get_tpu_info().vmem_capacity_bytes)
    except Exception:  # pragma: no cover - conservative fallback
        cap = 64 * 1024 * 1024
    return int(cap * 0.8)


def _ffn_kernel(x_ref, w1_ref, b1_ref, w2_ref, b2_ref, g_ref, beta_ref,
                o_ref, acc_ref, *, eps: float, d_valid: int, tc: int):
    # Grid: (row_tiles, dff_tiles); dff axis is the reduction axis (innermost).
    k = pl.program_id(1)

    @pl.when(k == 0)
    def _():
        acc_ref[...] = jnp.zeros_like(acc_ref)

    # x block arrives already in bf16 (cast once in the wrapper).
    x_bf = x_ref[...]
    tk = w1_ref.shape[1]

    # Sub-chunk the tk hidden slice (static unroll) so the W2 matmul on chunk j
    # overlaps the W1 matmul on chunk j+1 instead of serialising on ReLU.
    for j in range(tk // tc):
        lo, hi = j * tc, (j + 1) * tc
        # ---- Linear(d_model -> tc slice of dff) + ReLU, bf16 MXU / f32 acc --
        h = jnp.dot(x_bf, w1_ref[:, lo:hi], preferred_element_type=jnp.float32)
        h = jnp.maximum(h + b1_ref[:, lo:hi], 0.0)
        # ---- partial Linear(tc slice of dff -> d_model), accumulate in f32 --
        acc_ref[...] += jnp.dot(h.astype(jnp.bfloat16), w2_ref[lo:hi, :],
                                preferred_element_type=jnp.float32)

    # TODO(synk): nn.Dropout is identity at inference; training-mode dropout
    # would need pltpu.prng_random_bits + masking on the accumulated y.

    @pl.when(k == pl.num_programs(1) - 1)
    def _():
        # Residual add in f32 (x upcast from bf16; see accuracy note in wrapper).
        r = x_ref[...].astype(jnp.float32) + acc_ref[...] + b2_ref[...]

        d_pad = r.shape[-1]
        # Padded columns of x / acc / b2 are exactly zero by construction, so
        # the row sum already equals the sum over the real d_model columns.
        mean = jnp.sum(r, axis=-1, keepdims=True) * (1.0 / d_valid)
        c = r - mean
        if d_pad != d_valid:
            # Only the centered values need masking (padded cols became -mean).
            mask = jax.lax.broadcasted_iota(jnp.int32, r.shape, 1) < d_valid
            c = jnp.where(mask, c, 0.0)
        var = jnp.sum(c * c, axis=-1, keepdims=True) * (1.0 / d_valid)
        inv = jax.lax.rsqrt(var + eps)
        o_ref[...] = (c * inv * g_ref[...] + beta_ref[...]).astype(o_ref.dtype)


def make_feed_forward(w1, b1, w2, b2, gamma, beta, *, eps: float = 1e-5,
                      tm: int = 512, tk: int = 512, out_dtype=None):
    """Returns a jitted fn(x: [B, S, d_model]) -> [B, S, d_model].

    Weights / biases / LN params are padded and cast to their kernel dtypes
    HERE, once, so the per-call path does not re-stream them through HBM.
    Note: x and the weights are fed to the MXU in bf16 (f32 accumulation);
    the residual therefore uses bf16-rounded x. This is an accuracy/perf
    trade-off, not a bug (set out_dtype / keep f32 elsewhere if needed).
    """
    d_model, dff = w1.shape
    d_pad = _round_up(d_model, 128)
    dff_pad = _round_up(dff, 128)

    # ---- hoisted per-call work: pad + cast parameters once -----------------
    w1p = jnp.pad(w1, ((0, d_pad - d_model), (0, dff_pad - dff))
                  ).astype(jnp.bfloat16)
    w2p = jnp.pad(w2, ((0, dff_pad - dff), (0, d_pad - d_model))
                  ).astype(jnp.bfloat16)
    b1p = jnp.pad(b1, (0, dff_pad - dff)).astype(jnp.float32).reshape(1, dff_pad)
    b2p = jnp.pad(b2, (0, d_pad - d_model)).astype(jnp.float32).reshape(1, d_pad)
    gp = jnp.pad(gamma, (0, d_pad - d_model)).astype(jnp.float32).reshape(1, d_pad)
    bp = jnp.pad(beta, (0, d_pad - d_model)).astype(jnp.float32).reshape(1, d_pad)

    # tk: multiple of 128 that divides dff_pad (no wasted padded matmul work).
    tk0 = max(128, min(tk, dff_pad) // 128 * 128)
    while dff_pad % tk0 != 0:
        tk0 -= 128

    vmem_ceiling = _vmem_ceiling_bytes()
    tm_req = max(8, tm // 8 * 8)

    def fn(x):
        batch, seq, _ = x.shape
        N = batch * seq
        out_dt = jnp.dtype(out_dtype) if out_dtype is not None else x.dtype
        out_itemsize = out_dt.itemsize

        # ---- row tile: large for arithmetic intensity, but keep >= 2 row
        # tiles so the 'parallel' axis shards across v7x's 2 TensorCores. ----
        if N >= 16:
            tm_sel = min(tm_req, _round_up((N + 1) // 2, 8))
        else:
            tm_sel = min(tm_req, _round_up(max(N, 1), 8))
        tm_sel = max(tm_sel, 8)
        tk_sel = tk0

        # ---- fit double-buffered tiles under the per-generation VMEM budget;
        # shrink the weight tile (tk) before the row tile (tm). --------------
        def need(tm_, tk_):
            return (2 * tm_ * d_pad * 2            # x blocks (bf16)
                    + 2 * d_pad * tk_ * 2          # W1 blocks (bf16)
                    + 2 * tk_ * d_pad * 2          # W2 blocks (bf16)
                    + 2 * 8 * tk_ * 4              # b1 blocks (sublane-padded)
                    + 3 * 2 * 8 * d_pad * 4        # b2 / gamma / beta
                    + 2 * tm_ * d_pad * out_itemsize  # output blocks
                    + tm_ * d_pad * 4)             # f32 accumulator scratch
        while need(tm_sel, tk_sel) > vmem_ceiling and tk_sel > 128:
            nt = tk_sel - 128
            while dff_pad % nt != 0:
                nt -= 128
            tk_sel = nt
        while need(tm_sel, tk_sel) > vmem_ceiling and tm_sel > 8:
            tm_sel = max(8, (tm_sel // 2) // 8 * 8)

        N_pad = _round_up(N, tm_sel)
        grid = (N_pad // tm_sel, dff_pad // tk_sel)
        tc = 256 if tk_sel % 256 == 0 else 128

        # x cast to bf16 ONCE here (MXU operand + residual source).
        x2 = jnp.pad(x.reshape(N, d_model),
                     ((0, N_pad - N), (0, d_pad - d_model))).astype(jnp.bfloat16)

        vmem_limit = int(min(max(need(tm_sel, tk_sel) * 3 // 2,
                                 32 * 1024 * 1024), vmem_ceiling))

        cost = pl.CostEstimate(
            flops=4 * N_pad * d_pad * dff_pad + 10 * N_pad * d_pad,
            transcendentals=N_pad,
            bytes_accessed=(
                N_pad * d_pad * 2                          # x in (bf16)
                + N_pad * d_pad * out_itemsize             # out
                + grid[0] * 2 * d_pad * dff_pad * 2        # W1+W2 per row tile
                + grid[0] * (dff_pad + 3 * d_pad) * 4),    # biases / LN params
        )

        kernel = functools.partial(_ffn_kernel, eps=eps, d_valid=d_model, tc=tc)

        out2 = pl.pallas_call(
            kernel,
            out_shape=jax.ShapeDtypeStruct((N_pad, d_pad), out_dt),
            grid_spec=pltpu.PrefetchScalarGridSpec(
                num_scalar_prefetch=0,
                grid=grid,
                in_specs=[
                    pl.BlockSpec((tm_sel, d_pad), lambda i, k: (i, 0)),   # x
                    pl.BlockSpec((d_pad, tk_sel), lambda i, k: (0, k)),   # W1
                    pl.BlockSpec((1, tk_sel), lambda i, k: (0, k)),       # b1
                    pl.BlockSpec((tk_sel, d_pad), lambda i, k: (k, 0)),   # W2
                    pl.BlockSpec((1, d_pad), lambda i, k: (0, 0)),        # b2
                    pl.BlockSpec((1, d_pad), lambda i, k: (0, 0)),        # gamma
                    pl.BlockSpec((1, d_pad), lambda i, k: (0, 0)),        # beta
                ],
                out_specs=pl.BlockSpec((tm_sel, d_pad), lambda i, k: (i, 0)),
                scratch_shapes=[pltpu.VMEM((tm_sel, d_pad), jnp.float32)],
            ),
            compiler_params=pltpu.CompilerParams(
                dimension_semantics=("parallel", "arbitrary"),
                vmem_limit_bytes=vmem_limit,
            ),
            cost_estimate=cost,
        )(x2, w1p, b1p, w2p, b2p, gp, bp)

        return out2[:N, :d_model].reshape(batch, seq, d_model)

    return jax.jit(fn)


def feed_forward_ref(x, w1, b1, w2, b2, gamma, beta, eps=1e-5):
    h = jnp.maximum(x @ w1 + b1, 0.0)
    y = h @ w2 + b2
    r = x + y
    mean = jnp.mean(r, axis=-1, keepdims=True)
    var = jnp.mean((r - mean) ** 2, axis=-1, keepdims=True)
    return (r - mean) * jax.lax.rsqrt(var + eps) * gamma + beta


if __name__ == "__main__":
    batch, seq, d_model, dff = 2, 8, 32, 64

    key = jax.random.PRNGKey(0)
    kx, k1, k2, k3, k4 = jax.random.split(key, 5)

    x = jax.random.normal(kx, (batch, seq, d_model), dtype=jnp.float32)

    # Deterministic parameter init (uniform, like torch's kaiming-uniform scale)
    lim1 = 1.0 / (d_model ** 0.5)
    lim2 = 1.0 / (dff ** 0.5)
    w1 = jax.random.uniform(k1, (d_model, dff), jnp.float32, -lim1, lim1)
    b1 = jax.random.uniform(k2, (dff,), jnp.float32, -lim1, lim1)
    w2 = jax.random.uniform(k3, (dff, d_model), jnp.float32, -lim2, lim2)
    b2 = jax.random.uniform(k4, (d_model,), jnp.float32, -lim2, lim2)
    gamma = jnp.ones((d_model,), jnp.float32)
    beta = jnp.zeros((d_model,), jnp.float32)

    ffn = make_feed_forward(w1, b1, w2, b2, gamma, beta)
    out = ffn(x)
    out = jax.block_until_ready(out)

    ref = feed_forward_ref(x, w1, b1, w2, b2, gamma, beta)
    assert out.shape == (batch, seq, d_model)
    # bf16 MXU operands + bf16 x block (f32 accumulation / f32 LayerNorm)
    # -> loosened tolerance vs the f32 reference.
    assert jnp.allclose(out, ref, atol=3e-2, rtol=3e-2), (
        "mismatch vs reference: max abs diff = "
        f"{float(jnp.max(jnp.abs(out - ref)))}")

    print("KERNEL_OK")
</pallas_src>

<mosaic_0001>
module attributes {stable_mosaic.version = 11 : i64} {
  func.func @_ffn_kernel(%arg0: i32, %arg1: i32, %arg2: memref<8x128xbf16, #tpu.memory_space<vmem>>, %arg3: memref<128x128xbf16, #tpu.memory_space<vmem>>, %arg4: memref<1x128xf32, #tpu.memory_space<vmem>>, %arg5: memref<128x128xbf16, #tpu.memory_space<vmem>>, %arg6: memref<1x128xf32, #tpu.memory_space<vmem>>, %arg7: memref<1x128xf32, #tpu.memory_space<vmem>>, %arg8: memref<1x128xf32, #tpu.memory_space<vmem>>, %arg9: memref<8x128xf32, #tpu.memory_space<vmem>>, %arg10: memref<8x128xf32, #tpu.memory_space<vmem>>) attributes {dimension_semantics = [#tpu.dimension_semantics<parallel>, #tpu.dimension_semantics<arbitrary>], iteration_bounds = array<i64: 2, 1>, scalar_prefetch = 0 : i64, scratch_operands = 1 : i64, tpu.core_type = #tpu.core_type<tc>, window_params = [{transform_indices = @transform_0, window_bounds = array<i64: 8, 128>}, {transform_indices = @transform_1, window_bounds = array<i64: 128, 128>}, {transform_indices = @transform_2, window_bounds = array<i64: 1, 128>}, {transform_indices = @transform_3, window_bounds = array<i64: 128, 128>}, {pipeline_mode = #tpu.pipeline_mode<synchronous>, transform_indices = @transform_4, window_bounds = array<i64: 1, 128>}, {pipeline_mode = #tpu.pipeline_mode<synchronous>, transform_indices = @transform_5, window_bounds = array<i64: 1, 128>}, {pipeline_mode = #tpu.pipeline_mode<synchronous>, transform_indices = @transform_6, window_bounds = array<i64: 1, 128>}, {transform_indices = @transform_7, window_bounds = array<i64: 8, 128>}]} {
    %c0_i32 = arith.constant 0 : i32
    %0 = arith.cmpi eq, %arg1, %c0_i32 : i32
    %1 = arith.extui %0 : i1 to i32
    %c0_i32_0 = arith.constant 0 : i32
    %2 = arith.cmpi ne, %1, %c0_i32_0 : i32
    scf.if %2 {
      %cst_16 = arith.constant 0.000000e+00 : f32
      %20 = vector.broadcast %cst_16 : f32 to vector<8x128xf32>
      %c0_17 = arith.constant 0 : index
      %c0_18 = arith.constant 0 : index
      %21 = vector.load %arg10[%c0_17, %c0_18] : memref<8x128xf32, #tpu.memory_space<vmem>>, vector<8x128xf32>
      tpu.vector_store %arg10[%c0_17, %c0_18], %20 {strides = array<i32>} : memref<8x128xf32, #tpu.memory_space<vmem>>, vector<8x128xf32>,
    } else {
    }
    %c0 = arith.constant 0 : index
    %c0_1 = arith.constant 0 : index
    %3 = vector.load %arg2[%c0, %c0_1] : memref<8x128xbf16, #tpu.memory_space<vmem>>, vector<8x128xbf16>
    %c0_2 = arith.constant 0 : index
    %c0_3 = arith.constant 0 : index
    %4 = vector.load %arg3[%c0_2, %c0_3] : memref<128x128xbf16, #tpu.memory_space<vmem>>, vector<128x128xbf16>
    %cst = arith.constant dense<0.000000e+00> : vector<8x128xf32>
    %5 = tpu.matmul %3, %4, %cst {dimension_numbers = #tpu.dot_dimension_numbers<[1], [0], [0], [1], [0, 0, 1, 1], [], []>} : vector<8x128xbf16>, vector<128x128xbf16>, vector<8x128xf32> -> vector<8x128xf32>
    %c0_4 = arith.constant 0 : index
    %c0_5 = arith.constant 0 : index
    %6 = vector.load %arg4[%c0_4, %c0_5] : memref<1x128xf32, #tpu.memory_space<vmem>>, vector<1x128xf32>
    %7 = vector.broadcast %6 : vector<1x128xf32> to vector<8x128xf32>
    %8 = arith.addf %5, %7 : vector<8x128xf32>
    %cst_6 = arith.constant 0.000000e+00 : f32
    %9 = vector.broadcast %cst_6 : f32 to vector<8x128xf32>
    %10 = arith.maximumf %8, %9 : vector<8x128xf32>
    %c0_7 = arith.constant 0 : index
    %c0_8 = arith.constant 0 : index
    %11 = vector.load %arg10[%c0_7, %c0_8] : memref<8x128xf32, #tpu.memory_space<vmem>>, vector<8x128xf32>
    %12 = arith.truncf %10 : vector<8x128xf32> to vector<8x128xbf16>
    %c0_9 = arith.constant 0 : index
    %c0_10 = arith.constant 0 : index
    %13 = vector.load %arg5[%c0_9, %c0_10] : memref<128x128xbf16, #tpu.memory_space<vmem>>, vector<128x128xbf16>
    %cst_11 = arith.constant dense<0.000000e+00> : vector<8x128xf32>
    %14 = tpu.matmul %12, %13, %cst_11 {dimension_numbers = #tpu.dot_dimension_numbers<[1], [0], [0], [1], [0, 0, 1, 1], [], []>} : vector<8x128xbf16>, vector<128x128xbf16>, vector<8x128xf32> -> vector<8x128xf32>
    %15 = arith.addf %11, %14 : vector<8x128xf32>
    %c0_12 = arith.constant 0 : index
    %c0_13 = arith.constant 0 : index
    %16 = vector.load %arg10[%c0_12, %c0_13] : memref<8x128xf32, #tpu.memory_space<vmem>>, vector<8x128xf32>
    tpu.vector_store %arg10[%c0_12, %c0_13], %15 {strides = array<i32>} : memref<8x128xf32, #tpu.memory_space<vmem>>, vector<8x128xf32>,
    %c0_i32_14 = arith.constant 0 : i32
    %17 = arith.cmpi eq, %arg1, %c0_i32_14 : i32
    %18 = arith.extui %17 : i1 to i32
    %c0_i32_15 = arith.constant 0 : i32
    %19 = arith.cmpi ne, %18, %c0_i32_15 : i32
    scf.if %19 {
      %c0_16 = arith.constant 0 : index
      %c0_17 = arith.constant 0 : index
      %20 = vector.load %arg2[%c0_16, %c0_17] : memref<8x128xbf16, #tpu.memory_space<vmem>>, vector<8x128xbf16>
      %21 = arith.extf %20 : vector<8x128xbf16> to vector<8x128xf32>
      %c0_18 = arith.constant 0 : index
      %c0_19 = arith.constant 0 : index
      %22 = vector.load %arg10[%c0_18, %c0_19] : memref<8x128xf32, #tpu.memory_space<vmem>>, vector<8x128xf32>
      %23 = arith.addf %21, %22 : vector<8x128xf32>
      %c0_20 = arith.constant 0 : index
      %c0_21 = arith.constant 0 : index
      %24 = vector.load %arg6[%c0_20, %c0_21] : memref<1x128xf32, #tpu.memory_space<vmem>>, vector<1x128xf32>
      %25 = vector.broadcast %24 : vector<1x128xf32> to vector<8x128xf32>
      %26 = arith.addf %23, %25 : vector<8x128xf32>
      %cst_22 = arith.constant dense<0.000000e+00> : vector<8xf32>
      %27 = vector.multi_reduction <add>, %26, %cst_22 [1] : vector<8x128xf32> to vector<8xf32>
      %28 = vector.shape_cast %27 : vector<8xf32> to vector<8x1xf32>
      %cst_23 = arith.constant 3.125000e-02 : f32
      %29 = vector.broadcast %cst_23 : f32 to vector<8x1xf32>
      %30 = arith.mulf %28, %29 : vector<8x1xf32>
      %31 = vector.broadcast %30 : vector<8x1xf32> to vector<8x128xf32>
      %32 = arith.subf %26, %31 : vector<8x128xf32>
      %33 = tpu.iota {dimensions = array<i32: 1>} : vector<8x128xi32>
      %c32_i32 = arith.constant 32 : i32
      %34 = vector.broadcast %c32_i32 : i32 to vector<8x128xi32>
      %35 = arith.cmpi slt, %33, %34 : vector<8x128xi32>
      %cst_24 = arith.constant 0.000000e+00 : f32
      %36 = vector.broadcast %cst_24 : f32 to vector<8x128xf32>
      %37 = arith.select %35, %32, %36 : vector<8x128xi1>, vector<8x128xf32>
      %38 = arith.mulf %37, %37 : vector<8x128xf32>
      %cst_25 = arith.constant dense<0.000000e+00> : vector<8xf32>
      %39 = vector.multi_reduction <add>, %38, %cst_25 [1] : vector<8x128xf32> to vector<8xf32>
      %40 = vector.shape_cast %39 : vector<8xf32> to vector<8x1xf32>
      %cst_26 = arith.constant 3.125000e-02 : f32
      %41 = vector.broadcast %cst_26 : f32 to vector<8x1xf32>
      %42 = arith.mulf %40, %41 : vector<8x1xf32>
      %cst_27 = arith.constant 9.99999974E-6 : f32
      %43 = vector.broadcast %cst_27 : f32 to vector<8x1xf32>
      %44 = arith.addf %42, %43 : vector<8x1xf32>
      %45 = math.rsqrt %44 : vector<8x1xf32>
      %46 = vector.broadcast %45 : vector<8x1xf32> to vector<8x128xf32>
      %47 = arith.mulf %37, %46 : vector<8x128xf32>
      %c0_28 = arith.constant 0 : index
      %c0_29 = arith.constant 0 : index
      %48 = vector.load %arg7[%c0_28, %c0_29] : memref<1x128xf32, #tpu.memory_space<vmem>>, vector<1x128xf32>
      %49 = vector.broadcast %48 : vector<1x128xf32> to vector<8x128xf32>
      %50 = arith.mulf %47, %49 : vector<8x128xf32>
      %c0_30 = arith.constant 0 : index
      %c0_31 = arith.constant 0 : index
      %51 = vector.load %arg8[%c0_30, %c0_31] : memref<1x128xf32, #tpu.memory_space<vmem>>, vector<1x128xf32>
      %52 = vector.broadcast %51 : vector<1x128xf32> to vector<8x128xf32>
      %53 = arith.addf %50, %52 : vector<8x128xf32>
      %c0_32 = arith.constant 0 : index
      %c0_33 = arith.constant 0 : index
      %54 = vector.load %arg9[%c0_32, %c0_33] : memref<8x128xf32, #tpu.memory_space<vmem>>, vector<8x128xf32>
      tpu.vector_store %arg9[%c0_32, %c0_33], %53 {strides = array<i32>} : memref<8x128xf32, #tpu.memory_space<vmem>>, vector<8x128xf32>,
    } else {
    }
    return
  }
  func.func @transform_0(%arg0: i32, %arg1: i32) -> (i32, i32) {
    %c0_i32 = arith.constant 0 : i32
    %c0_i32_0 = arith.constant 0 : i32
    return %arg0, %c0_i32 : i32, i32
  }
  func.func @transform_1(%arg0: i32, %arg1: i32) -> (i32, i32) {
    %c0_i32 = arith.constant 0 : i32
    %c0_i32_0 = arith.constant 0 : i32
    return %c0_i32, %arg1 : i32, i32
  }
  func.func @transform_2(%arg0: i32, %arg1: i32) -> (i32, i32) {
    %c0_i32 = arith.constant 0 : i32
    %c0_i32_0 = arith.constant 0 : i32
    return %c0_i32, %arg1 : i32, i32
  }
  func.func @transform_3(%arg0: i32, %arg1: i32) -> (i32, i32) {
    %c0_i32 = arith.constant 0 : i32
    %c0_i32_0 = arith.constant 0 : i32
    return %arg1, %c0_i32 : i32, i32
  }
  func.func @transform_4(%arg0: i32, %arg1: i32) -> (i32, i32) {
    %c0_i32 = arith.constant 0 : i32
    %c0_i32_0 = arith.constant 0 : i32
    %c0_i32_1 = arith.constant 0 : i32
    return %c0_i32, %c0_i32_0 : i32, i32
  }
  func.func @transform_5(%arg0: i32, %arg1: i32) -> (i32, i32) {
    %c0_i32 = arith.constant 0 : i32
    %c0_i32_0 = arith.constant 0 : i32
    %c0_i32_1 = arith.constant 0 : i32
    return %c0_i32, %c0_i32_0 : i32, i32
  }
  func.func @transform_6(%arg0: i32, %arg1: i32) -> (i32, i32) {
    %c0_i32 = arith.constant 0 : i32
    %c0_i32_0 = arith.constant 0 : i32
    %c0_i32_1 = arith.constant 0 : i32
    return %c0_i32, %c0_i32_0 : i32, i32
  }
  func.func @transform_7(%arg0: i32, %arg1: i32) -> (i32, i32) {
    %c0_i32 = arith.constant 0 : i32
    %c0_i32_0 = arith.constant 0 : i32
    return %arg0, %c0_i32 : i32, i32
  }
}

</mosaic_0001>

<bundles_post_ra>
// kernel: fn.1
= control target key start
LH: loop header
LB: loop body
LE: loop exit
PB: predicated region body
PF: predicated region fallthrough
CT: control target
= control target key end

     0   :  { %12 = vsyncpa [#allocation4], 0  ;;  %s970_s24 = smov 0   ;;  %s972_s25 = smov 0   ;;  %s1086_s0 = inlined_call_operand.vmem [shape: bf16[16,128], index: 0, kind: input, shape index: {}]   ;;  %s1087_s1 = inlined_call_operand.hbm [shape: bf16[128,128], index: 1, kind: input, shape index: {}]   ;;  %s1088_s2 = inlined_call_operand.vmem [shape: f32[1,128], index: 2, kind: input, shape index: {}]   ;;  %s1089_s3 = inlined_call_operand.vmem [shape: bf16[128,128], index: 3, kind: input, shape index: {}]   ;;  %s1090_s4 = inlined_call_operand.vmem [shape: f32[1,128], index: 4, kind: input, shape index: {}]   ;;  %s1091_s5 = inlined_call_operand.vmem [shape: f32[1,128], index: 5, kind: input, shape index: {}]   ;;  %s1092_s6 = inlined_call_operand.vmem [shape: f32[1,128], index: 6, kind: input, shape index: {}]   ;;  %s1093_s7 = inlined_call_operand.vmem [shape: f32[16,128], index: 7, kind: output, shape index: {}]  }
   0x1   :  { %s974_s26 = smov 0  }
   0x2 LB: > { %s721_s27 = sadd.s32 4294967295, %s923_s26   ;;  %s30_s28 = sadd.s32 1, %s919_s25  ;;  %s923_s26 = sphi %s974_s26, %s18_s26   ;;  %s919_s25 = sphi %s972_s25, %s1103_s25   ;;  %s915_s24 = sphi %s970_s24, %s1102_s24  }
   0x3   : > { %p32_p0 = scmp.ge.s32.totalorder %s30_s28, 2  ;;  %p723_p1 = scmp.ge.s32.totalorder %s923_s26, 1 }
   0x4   : > { %p228_p2 = scmp.lt.s32.totalorder %s923_s26, 3  ;;  %p995_p4 = scmp.eq.s32.totalorder %s721_s27, 0 }
   0x5   : > { %s1105_s28 = smov (%p32_p0, %s30_s28), 0  ;;  %s925_s8 = smov [#allocation3]  }
   0x6   : > { %p991_p3 = pnand %p723_p1, %p228_p2  ;;  %s242_s9 = sshll.u32 %s925_s8, 4  ;;  %s243_s9 = int_to_ptr.vmem [resolvable:$true] %s242_s9 }
   0x7   : > { %s1098_s30 = scalar_select %p995_p4, 1, 0 }
   0x8   : > { %s1097_s29 = scalar_select %p991_p3, 1, 0 }
   0x9   : > { %p816_p5 = pneg %p991_p3  ;;  %s869_s13 = scalar_lea.hbm %s1087_s1, 1024 }
   0xa   : > { %p870_p7 = scmp.ne.s32.totalorder %s1087_s1, %s869_s13  ;;  %p876_p11 = scmp.lt.u32.totalorder %s869_s13, %s1087_s1 }
   0xb   : > { %p1003_p6 = pnand %p995_p4, %p816_p5 }
   0xd   : > { %p871_p8 = pneg %p1003_p6 }
   0xf   : > { %p872_p9 = pnand %p871_p8, %p870_p7 }
  0x11   : > { %p873_p10 = pneg %p872_p9 }
  0x13   : > { %p878_p12 = pnand %p876_p11, %p873_p10 }
  0x15   : > { %881 = shalt.err (!%p878_p12)
}
  0x16   : > { %s882_s18 = scalar_lea.vmem %s243_s9, 1024  ;;  %p890_p2 = scmp.lt.s32.totalorder %s243_s9, %s243_s9 }
  0x17   : > { %p883_p13 = scmp.ne.s32.totalorder %s243_s9, %s882_s18  ;;  %p891_p5 = scmp.lt.s32.totalorder %s882_s18, %s882_s18 }
  0x19   : > { %p885_p0 = pnand %p883_p13, %p871_p8  ;;  %p892_p4 = por %p891_p5, %p890_p2 }
  0x1b   : > { %p886_p1 = pneg %p885_p0 }
  0x1d   : > { %p893_p3 = pnand %p892_p4, %p886_p1 }
  0x1f   : > { %896 = shalt.err (!%p893_p3)
}
  0x20   : > { %s926_s19 = smov 64   ;;  %s927_s20 = smov 4  }
  0x21   : > { %819 = dma.hbm_to_vmem [thread:$0]  (!%p1003_p6), %s1087_s1, 1024, %s243_s9, [#allocation4], %s926_s19, %s926_s19, %s927_s20  }
  0x22   : > { %p1100_p7 = scmp.ne.s32.totalorder %s1097_s29, 0 }
  0x23   : > { %p1101_p9 = scmp.ne.s32.totalorder (!%p1100_p7), %s1098_s30, 0 }
  0x24   : > { %289 = sbr.rel (%p1100_p7) target bundleno = 825 (0x339), region = 48 }
  0x2b   : > { %910 = dma.done.wait (%p1101_p9), [#allocation4], 1024  }
  0x2c   : > { %912 = vsyncadd (%p1101_p9), [#allocation4], 4294966272  ;;  %v928_v0 = vmov 0.0   ;;  %vm929_vm0 = vmmov 0   ;;  %v851_v1 = vld [vmem:[#allocation3] sm:$0xff]   ;;  %v852_v2 = vld [vmem:[#allocation3 + $0x8] sm:$0xff]   ;;  %v590_v35 = vlaneseq }
  0x2d   : > { %772 = vmatprep.subr.bf16.mxu0 %v928_v0  ;;  %788 = vmatprep.mubr.msk.bf16.mxu0 %vm929_vm0, %v928_v0  ;;  %v853_v3 = vld [vmem:[#allocation3 + $0x10] sm:$0xff]   ;;  %v859_v4 = vld [vmem:[%s1089_s3] sm:$0xff]   ;;  %v854_v5 = vld [vmem:[#allocation3 + $0x18] sm:$0xff]   ;;  %p327_p3 = scmp.lt.s32.totalorder %s915_s24, 1 }
  0x2e   : > { %792 = vmatprep.subr.bf16.mxu1 %v928_v0  ;;  %808 = vmatprep.mubr.msk.bf16.mxu1 %vm929_vm0, %v928_v0  ;;  %v860_v6 = vld [vmem:[%s1089_s3 + $0x8] sm:$0xff]   ;;  %v855_v7 = vld [vmem:[#allocation3 + $0x20] sm:$0xff]   ;;  %v861_v8 = vld [vmem:[%s1089_s3 + $0x10] sm:$0xff]   ;;  %v591_v36 = vand.u32 127, %v590_v35 }
  0x2f   : > { %773 = vmatpush3.bf16.msra.mxu0 %v851_v1  ;;  %793 = vmatpush3.bf16.msra.mxu1 %v859_v4  ;;  %v856_v9 = vld [vmem:[#allocation3 + $0x28] sm:$0xff]   ;;  %v862_v10 = vld [vmem:[%s1089_s3 + $0x18] sm:$0xff]   ;;  %s1107_s24 = smov (!%p327_p3, %s915_s24), 1  ;;  %v857_v11 = vld [vmem:[#allocation3 + $0x30] sm:$0xff]  }
  0x30   : > { %774 = vmatprep.subr.bf16.mxu0 %v928_v0  ;;  %794 = vmatprep.subr.bf16.mxu1 %v928_v0  ;;  %v863_v12 = vld [vmem:[%s1089_s3 + $0x20] sm:$0xff]   ;;  %s730_s14 = sshll.u32 %s1107_s24, 2  ;;  %v858_v13 = vld [vmem:[#allocation3 + $0x38] sm:$0xff]   ;;  %v864_v14 = vld [vmem:[%s1089_s3 + $0x28] sm:$0xff]   ;;  %vm592_vm1 = vcmp.lt.s32.totalorder %v591_v36, 32  ;;  %s731_s11 = sshll.u32 %s1107_s24, 3 }
  0x31   : > { %s330_s17 = scalar_lea.vmem %s1086_s0, %s730_s14  ;;  %v865_v16 = vld [vmem:[%s1089_s3 + $0x30] sm:$0xff]   ;;  %v866_v17 = vld [vmem:[%s1089_s3 + $0x38] sm:$0xff]   ;;  %v732_v18 = vld [vmem:[%s1088_s2] ss:$0 sm:$0xff]  ;;  %s343_s16 = scalar_lea.vmem %s1093_s7, %s731_s11 }
  0x32   : > { %v350_v15 = vld [vmem:[%s330_s17] sm:$0xf] }
  0x33   : > { %775 = vmatpush3.bf16.msra.mxu0 %v852_v2  ;;  %795 = vmatpush3.bf16.msra.mxu1 %v860_v6  ;;  %v574_v26 = vld [vmem:[%s330_s17] sm:$0xf] }
  0x34   : > { %776 = vmatprep.subr.bf16.mxu0 %v928_v0  ;;  %796 = vmatprep.subr.bf16.mxu1 %v928_v0  ;;  %v575_v27 = vunpack.c.l.bf16 %v574_v26  ;;  %v749_v29 = vld [vmem:[%s1090_s4] ss:$0 sm:$0xff] }
  0x35   : > { %v750_v46 = vld [vmem:[%s1091_s5] ss:$0 sm:$0xff] }
  0x36   : > { %v751_v48 = vld [vmem:[%s1092_s6] ss:$0 sm:$0xff] }
  0x37   : > { %777 = vmatpush3.bf16.msra.mxu0 %v853_v3  ;;  %797 = vmatpush3.bf16.msra.mxu1 %v861_v8 }
  0x38   : > { %778 = vmatprep.subr.bf16.mxu0 %v928_v0  ;;  %798 = vmatprep.subr.bf16.mxu1 %v928_v0 }
  0x3b   : > { %779 = vmatpush3.bf16.msra.mxu0 %v854_v5  ;;  %799 = vmatpush3.bf16.msra.mxu1 %v862_v10 }
  0x3c   : > { %780 = vmatprep.subr.bf16.mxu0 %v928_v0  ;;  %800 = vmatprep.subr.bf16.mxu1 %v928_v0 }
  0x3f   : > { %781 = vmatpush3.bf16.msra.mxu0 %v855_v7  ;;  %801 = vmatpush3.bf16.msra.mxu1 %v863_v12 }
  0x40   : > { %782 = vmatprep.subr.bf16.mxu0 %v928_v0  ;;  %802 = vmatprep.subr.bf16.mxu1 %v928_v0 }
  0x43   : > { %783 = vmatpush3.bf16.msra.mxu0 %v856_v9  ;;  %803 = vmatpush3.bf16.msra.mxu1 %v864_v14 }
  0x44   : > { %784 = vmatprep.subr.bf16.mxu0 %v928_v0  ;;  %804 = vmatprep.subr.bf16.mxu1 %v928_v0 }
  0x47   : > { %785 = vmatpush3.bf16.msra.mxu0 %v857_v11  ;;  %805 = vmatpush3.bf16.msra.mxu1 %v865_v16 }
  0x48   : > { %786 = vmatprep.subr.bf16.mxu0 %v928_v0  ;;  %806 = vmatprep.subr.bf16.mxu1 %v928_v0 }
  0x4b   : > { %787 = vmatpush3.bf16.msra.mxu0 %v858_v13  ;;  %807 = vmatpush3.bf16.msra.mxu1 %v866_v17 }
  0x4e   : > { %789 = vmatmul.mubr.bf16.vlgmr.msra.gmra.mrb[0].mxu0 %v350_v15 }
 0x121   : > { %v456_v19 = vpop.f32.mrb[0].mxu0 }
 0x122   : > { %v457_v20 = vadd.f32 %v732_v18, %v456_v19  ;;  %v790_v21 = vpop.f32.mrb[1].mxu0 }
 0x123   : > { %v459_v22 = vpop.f32.mrb[2].mxu0 }
 0x124   : > { %v462_v23 = vmax.f32 %v457_v20, 0.0  ;;  %v791_v24 = vpop.f32.mrb[3].mxu0 }
 0x126   : > { %v464_v25 = vpack.c.bf16 %v462_v23, %v462_v23 }
 0x128   : > { %809 = vmatmul.mubr.bf16.vlgmr.msra.gmra.mrb[0].mxu1 %v464_v25 }
 0x1fb   : > { %v563_v28 = vpop.f32.mrb[0].mxu1 }
 0x1fc   : > { %v577_v30 = vadd.f32 %v575_v27, %v563_v28  ;;  %v810_v31 = vpop.f32.mrb[1].mxu1 }
 0x1fd   : > { %v566_v32 = vpop.f32.mrb[2].mxu1 }
 0x1fe   : > { %v811_v33 = vpop.f32.mrb[3].mxu1  ;;  %v585_v34 = vadd.f32 %v749_v29, %v577_v30 }
 0x200   : > { %586 = vadd.xlane.f32.xlu0 %v585_v34 }
 0x28d   : > { %v587_v37 = vpop.xlane.xlu0 %586 }
 0x28e   : > { %v588_v38 = vmul.f32 0.03125, %v587_v37 }
 0x290   : > { %v589_v39 = vsub.f32 %v585_v34, %v588_v38 }
 0x292   : > { %v593_v40 = vsel %vm592_vm1, %v589_v39, 0.0 }
 0x293   : > { %v594_v41 = vmul.f32 %v593_v40, %v593_v40 }
 0x295   : > { %595 = vadd.xlane.f32.xlu0 %v594_v41 }
 0x322   : > { %v596_v42 = vpop.xlane.xlu0 %595 }
 0x323   : > { %v597_v43 = vmul.f32 0.03125, %v596_v42 }
 0x325   : > { %v598_v44 = vadd.f32 1e-05, %v597_v43 }
 0x327   : > { %867 = vrsqrt.f32 %v598_v44 }
 0x331   : > { %v868_v45 = vpop.eup %867 }
 0x332   : > { %v600_v47 = vmul.f32 %v868_v45, %v593_v40 }
 0x334   : > { %v608_v49 = vmul.f32 %v750_v46, %v600_v47 }
 0x336   : > { %v616_v50 = vadd.f32 %v751_v48, %v608_v49 }
 0x338   : > { %617 = vst [vmem:[%s343_s16] sm:$0xff] %v616_v50 }
 0x339 PF: > { %s18_s26 = sadd.s32 1, %s923_s26   ;;  %s1102_s24 = smov %s919_s25 }
 0x33a   : > { %p15_p4 = scmp.ge.s32.totalorder %s18_s26, 4   ;;  %s1103_s25 = smov %s1105_s28 }
 0x33c   :  { %17 = sbr.rel (!%p15_p4) target bundleno = 2 (0x2), region = 98 }
 0x343   :  { %637 = vsyncpa [#allocation4], 1 }
 0x344   :  { %639 = vsyncpa [#allocation4 + $0x1], 1 }

</bundles_post_ra>
